<compile_context>
chip_gen: v6e
topology: v6e:2x2x1
jax: 0.10.0
libtpu: 0.0.40
codegen_flags: <defaults>
</compile_context>

<pallas_src>
import functools

import jax
import jax.numpy as jnp
import numpy as np
from jax.experimental import pallas as pl
from jax.experimental.pallas import tpu as pltpu

LARGE_NUMBER = 1.0e10
_TIE_EPS = 1.0e-6          # unique-max tilt for the top-k arg-max
LANE = 128                 # lane tile
_MAX_BLOCK_ROWS = 256      # per-block sublane cap for large batches


def _round_up(x, m):
    return ((x + m - 1) // m) * m


# ----------------------------------------------------------------------------
# Fused Pallas kernel: padding bias -> top-k node_mask -> add/del edge weights
# One block contains rows of a single mode (add half or del half).
# ----------------------------------------------------------------------------
def _fused_topk_weight_kernel(x_ref, cnt_ref, out_ref, sel_ref, run_ref,
                              *, add_k, del_k, blocks_per_half):
    """x_ref/out_ref: [BR, NP] f32 VMEM (logits in / edge weights out).
    cnt_ref: [BR, 1] int32 VMEM (# real lanes per row).
    sel_ref/run_ref: [BR, NP] f32 VMEM scratch (top-k state)."""
    br, npad = out_ref.shape
    is_del = pl.program_id(0) >= blocks_per_half          # scalar: which half

    lane = jax.lax.broadcasted_iota(jnp.int32, (br, npad), 1)
    mask = (lane < cnt_ref[...]).astype(jnp.float32)       # 1 real / 0 padding

    # Fold the reference's `-deletion_logits` negation into the kernel.
    sign = jnp.where(is_del, -1.0, 1.0).astype(jnp.float32)
    biased = x_ref[...] * sign - (1.0 - mask) * LARGE_NUMBER

    # Unique-max tilt: a single ">= row_max" compare per step picks one lane
    # (one XLU reduction per top-k step instead of max + min).
    # NOTE: tie-break among real logits closer than _TIE_EPS may differ from
    # torch.topk ordering.
    run_ref[...] = biased - lane.astype(jnp.float32) * _TIE_EPS
    sel_ref[...] = jnp.zeros((br, npad), jnp.float32)

    def topk_step():
        running = run_ref[...]
        row_max = jnp.max(running, axis=-1, keepdims=True)
        onehot = (running >= row_max).astype(jnp.float32)
        # padding guard: selections on padding lanes never enter node_mask
        sel_ref[...] = sel_ref[...] + onehot * mask
        run_ref[...] = running - onehot * (2.0 * LARGE_NUMBER)

    kmin = min(add_k, del_k)
    kmax = max(add_k, del_k)
    for _ in range(kmin):
        topk_step()
    if kmax > kmin:
        k_this = jnp.where(is_del, del_k, add_k)            # scalar per block
        for step in range(kmin, kmax):
            @pl.when(step < k_this)                          # skip extra steps
            def _():
                topk_step()

    @pl.when(jnp.logical_not(is_del))
    def _():
        # add half: marginals * node_mask (eval path).
        # TODO(synk): exact SIMPLE exact-k marginal DP not ported; masked
        # softmax over candidates used as the marginal stand-in.
        b = x_ref[...] - (1.0 - mask) * LARGE_NUMBER         # recompute (vreg hygiene)
        row_max0 = jnp.max(b, axis=-1, keepdims=True)
        ex = jnp.exp(b - row_max0) * mask
        denom = jnp.sum(ex, axis=-1, keepdims=True)
        marginals = ex * pl.reciprocal(denom + 1e-30, approx=True)
        out_ref[...] = marginals * sel_ref[...]

    @pl.when(is_del)
    def _():
        # del half: 1 - node_mask on real lanes (exp/softmax fully skipped).
        out_ref[...] = (1.0 - sel_ref[...]) * mask


# ----------------------------------------------------------------------------
# Builder: precompute static index plumbing once, return jitted forward
# ----------------------------------------------------------------------------
def make_graph_rewirer(cand_idx, edge_index, cand_counts, dir_counts,
                       num_nodes_total, add_k, del_k, val_ensemble,
                       ensemble_E=1):
    """Eval-mode GraphRewirer.forward for a fixed batch structure.

    Returns forward(addition_logits, deletion_logits) -> (edge_index, weight)
    of the merged rewired batch (PyG Batch container not reproduced)."""
    # TODO(synk): only E==1 logit-ensemble channel supported (as in example).
    assert ensemble_E == 1
    copies = ensemble_E * val_ensemble
    B = len(cand_counts)
    assert len(dir_counts) == B

    # Block sizing: one block per half for small batches (grid of exactly 2),
    # 256-row blocks otherwise; blocks never straddle the add/del boundary.
    block_rows = min(_MAX_BLOCK_ROWS, _round_up(B, 8))
    b_pad = _round_up(B, block_rows)
    rows = 2 * b_pad                                    # add rows | del rows
    blocks_per_half = b_pad // block_rows
    n_blocks = 2 * blocks_per_half
    max_count = max(max(cand_counts), max(dir_counts), 1)
    npad = _round_up(max_count, LANE)                   # lane-dense (>=128 mult)

    n_add = int(sum(cand_counts))
    n_del = int(sum(dir_counts))

    # --- static input-gather table: packed logits -> lane-dense slab --------
    src_idx = np.full((rows, npad), n_add + n_del, np.int32)  # pad -> extra 0
    off = 0
    for g, c in enumerate(cand_counts):
        src_idx[g, :c] = np.arange(off, off + c)
        off += c
    for g, c in enumerate(dir_counts):
        src_idx[b_pad + g, :c] = np.arange(off, off + c)
        off += c

    # per-row lane counts (kernel builds the padding mask from these)
    counts = np.zeros((rows, 1), np.int32)
    counts[:B, 0] = np.asarray(cand_counts, np.int32)
    counts[b_pad:b_pad + B, 0] = np.asarray(dir_counts, np.int32)

    # --- static output-gather table: out.reshape(-1) -> merged weights ------
    # del: per-graph [directed | reversed] duplication, then copy-major tiling
    # (to_undirected(reduce='mean') collapses to a per-direction copy because
    #  the directed src<dst edges are unique).
    del_flat = []
    for g, c in enumerate(dir_counts):
        idx_g = list(range((b_pad + g) * npad, (b_pad + g) * npad + c))
        del_flat += idx_g + idx_g
    # add: whole-batch to_undirected duplication, then copy-major tiling
    add_flat = []
    for g, c in enumerate(cand_counts):
        add_flat += list(range(g * npad, g * npad + c))
    add_flat = add_flat + add_flat
    final_idx = np.concatenate(
        [np.tile(np.asarray(del_flat, np.int64), copies),
         np.tile(np.asarray(add_flat, np.int64), copies)]).astype(np.int32)

    # --- static edge_index plumbing (pure integer, host-side) ---------------
    cand_ei = np.asarray(cand_idx).T                    # [2, n_add]
    # TODO(synk): PyG's sorted coalesce ordering in to_undirected not
    # reproduced; edge set is equivalent.
    und_ei = np.concatenate([cand_ei, cand_ei[::-1]], axis=1)
    add_edge_index = np.concatenate(
        [und_ei + r * num_nodes_total for r in range(copies)], axis=1)
    repeat_edge_index = np.concatenate(
        [np.asarray(edge_index) + r * num_nodes_total for r in range(copies)],
        axis=1)
    merged_edge_index = jnp.asarray(
        np.concatenate([repeat_edge_index, add_edge_index], axis=1))

    # --- device constants ----------------------------------------------------
    src_idx_j = jnp.asarray(src_idx)
    counts_j = jnp.asarray(counts)
    final_idx_j = jnp.asarray(final_idx)

    # --- single fused pallas_call --------------------------------------------
    kern = functools.partial(_fused_topk_weight_kernel, add_k=add_k,
                             del_k=del_k, blocks_per_half=blocks_per_half)

    # VMEM budget: double-buffered in/out blocks + counts + 2 scratch tiles.
    block_bytes = block_rows * npad * 4
    vmem_est = 2 * (2 * block_bytes + block_rows * 4) + 2 * block_bytes
    cp_kwargs = dict(dimension_semantics=("parallel",))
    if vmem_est > 24 * 1024 * 1024:
        cp_kwargs["vmem_limit_bytes"] = min(int(vmem_est * 3 // 2),
                                            60 * 1024 * 1024)

    pallas_fn = pl.pallas_call(
        kern,
        out_shape=jax.ShapeDtypeStruct((rows, npad), jnp.float32),
        grid_spec=pltpu.PrefetchScalarGridSpec(
            num_scalar_prefetch=0,
            grid=(n_blocks,),
            in_specs=[pl.BlockSpec((block_rows, npad), lambda i: (i, 0)),
                      pl.BlockSpec((block_rows, 1), lambda i: (i, 0))],
            out_specs=pl.BlockSpec((block_rows, npad), lambda i: (i, 0)),
            scratch_shapes=[pltpu.VMEM((block_rows, npad), jnp.float32),
                            pltpu.VMEM((block_rows, npad), jnp.float32)]),
        compiler_params=pltpu.CompilerParams(**cp_kwargs),
    )

    @jax.jit
    def _forward_weights(addition_logits, deletion_logits):
        # static gather (no scatter): pack both problems into one lane-dense
        # slab; del-logit negation is done inside the kernel.
        vals = jnp.concatenate(
            [addition_logits[:, 0], deletion_logits[:, 0]],
            axis=0).astype(jnp.float32)
        vals = jnp.concatenate([vals, jnp.zeros((1,), jnp.float32)])
        slab = vals[src_idx_j]                           # (rows, npad)

        out = pallas_fn(slab, counts_j)

        # ONE flat gather reproduces: per-direction del duplication, add
        # to_undirected duplication, ensemble tiling and the del|add merge.
        return out.reshape(-1)[final_idx_j]

    def forward(addition_logits, deletion_logits):
        # TODO(synk): PyG Batch/Data containers and
        # sparsify_edge_weight_simplified bookkeeping not reproduced;
        # merged (edge_index, edge_weight) arrays returned directly.
        return merged_edge_index, _forward_weights(addition_logits,
                                                   deletion_logits)

    return forward


# ----------------------------------------------------------------------------
if __name__ == "__main__":
    key = jax.random.PRNGKey(0)

    # Synthetic batch of 2 graphs.
    # graph 0: 5 nodes, directed edges (src<dst): (0,1)(1,2)(2,3)(0,3)(3,4)
    # graph 1: 4 nodes, directed edges: (0,1)(1,2)(0,2)(2,3)   (offset +5)
    num_nodes = [5, 4]
    num_nodes_total = sum(num_nodes)
    dir_g0 = np.array([[0, 1, 2, 0, 3], [1, 2, 3, 3, 4]])
    dir_g1 = np.array([[0, 1, 0, 2], [1, 2, 2, 3]]) + 5
    ei_g0 = np.concatenate([dir_g0, dir_g0[::-1]], axis=1)     # [dir | rev]
    ei_g1 = np.concatenate([dir_g1, dir_g1[::-1]], axis=1)
    edge_index = np.concatenate([ei_g0, ei_g1], axis=1)        # [2, 18]
    dir_counts = [5, 4]

    # edge candidates (global node ids, src<dst)
    cand_g0 = np.array([[0, 2], [1, 3], [0, 4], [1, 4]])
    cand_g1 = np.array([[0, 3], [1, 3]]) + 5
    edge_candidate_idx = np.concatenate([cand_g0, cand_g1], axis=0)   # [6, 2]
    cand_counts = [4, 2]

    k1, k2 = jax.random.split(key)
    addition_logits = jax.random.normal(
        k1, (edge_candidate_idx.shape[0], 1), jnp.float32)            # [6, 1]
    deletion_logits = jax.random.normal(
        k2, (sum(dir_counts), 1), jnp.float32)                        # [9, 1]

    rewirer = make_graph_rewirer(
        edge_candidate_idx, edge_index, cand_counts, dir_counts,
        num_nodes_total, add_k=2, del_k=1, val_ensemble=2, ensemble_E=1)

    merged_ei, merged_w = rewirer(addition_logits, deletion_logits)
    jax.block_until_ready(merged_w)

    assert merged_ei.shape == (2, 2 * 18 + 2 * 2 * 6)
    assert merged_w.shape == (2 * 18 + 2 * 2 * 6,)
    assert bool(jnp.all(jnp.isfinite(merged_w)))
    assert float(jnp.min(merged_w)) >= -1e-6
    assert float(jnp.max(merged_w)) <= 1.0 + 1e-2
    print("KERNEL_OK")
</pallas_src>

<mosaic_0001>
module attributes {stable_mosaic.version = 11 : i64} {
  func.func @_fused_topk_weight_kernel(%arg0: i32, %arg1: memref<8x128xf32, #tpu.memory_space<vmem>>, %arg2: memref<8x1xi32, #tpu.memory_space<vmem>>, %arg3: memref<8x128xf32, #tpu.memory_space<vmem>>, %arg4: memref<8x128xf32, #tpu.memory_space<vmem>>, %arg5: memref<8x128xf32, #tpu.memory_space<vmem>>) attributes {dimension_semantics = [#tpu.dimension_semantics<parallel>], iteration_bounds = array<i64: 2>, scalar_prefetch = 0 : i64, scratch_operands = 2 : i64, tpu.core_type = #tpu.core_type<tc>, window_params = [{transform_indices = @transform_0, window_bounds = array<i64: 8, 128>}, {transform_indices = @transform_1, window_bounds = array<i64: 8, 1>}, {transform_indices = @transform_2, window_bounds = array<i64: 8, 128>}]} {
    %c1_i32 = arith.constant 1 : i32
    %0 = arith.cmpi sge, %arg0, %c1_i32 : i32
    %1 = tpu.iota {dimensions = array<i32: 1>} : vector<8x128xi32>
    %c0 = arith.constant 0 : index
    %c0_0 = arith.constant 0 : index
    %2 = vector.load %arg2[%c0, %c0_0] : memref<8x1xi32, #tpu.memory_space<vmem>>, vector<8x1xi32>
    %3 = vector.broadcast %2 : vector<8x1xi32> to vector<8x128xi32>
    %4 = arith.cmpi slt, %1, %3 : vector<8x128xi32>
    %5 = arith.extui %4 : vector<8x128xi1> to vector<8x128xi32>
    %6 = arith.sitofp %5 : vector<8x128xi32> to vector<8x128xf32>
    %cst = arith.constant -1.000000e+00 : f32
    %cst_1 = arith.constant 1.000000e+00 : f32
    %7 = arith.select %0, %cst, %cst_1 : f32
    %c0_2 = arith.constant 0 : index
    %c0_3 = arith.constant 0 : index
    %8 = vector.load %arg1[%c0_2, %c0_3] : memref<8x128xf32, #tpu.memory_space<vmem>>, vector<8x128xf32>
    %9 = vector.broadcast %7 : f32 to vector<8x128xf32>
    %10 = arith.mulf %8, %9 : vector<8x128xf32>
    %cst_4 = arith.constant 1.000000e+00 : f32
    %11 = vector.broadcast %cst_4 : f32 to vector<8x128xf32>
    %12 = arith.subf %11, %6 : vector<8x128xf32>
    %cst_5 = arith.constant 1.000000e+10 : f32
    %13 = vector.broadcast %cst_5 : f32 to vector<8x128xf32>
    %14 = arith.mulf %12, %13 : vector<8x128xf32>
    %15 = arith.subf %10, %14 : vector<8x128xf32>
    %16 = arith.sitofp %1 : vector<8x128xi32> to vector<8x128xf32>
    %cst_6 = arith.constant 9.99999997E-7 : f32
    %17 = vector.broadcast %cst_6 : f32 to vector<8x128xf32>
    %18 = arith.mulf %16, %17 : vector<8x128xf32>
    %19 = arith.subf %15, %18 : vector<8x128xf32>
    %c0_7 = arith.constant 0 : index
    %c0_8 = arith.constant 0 : index
    %20 = vector.load %arg5[%c0_7, %c0_8] : memref<8x128xf32, #tpu.memory_space<vmem>>, vector<8x128xf32>
    tpu.vector_store %arg5[%c0_7, %c0_8], %19 {strides = array<i32>} : memref<8x128xf32, #tpu.memory_space<vmem>>, vector<8x128xf32>,
    %cst_9 = arith.constant 0.000000e+00 : f32
    %21 = vector.broadcast %cst_9 : f32 to vector<8x128xf32>
    %c0_10 = arith.constant 0 : index
    %c0_11 = arith.constant 0 : index
    %22 = vector.load %arg4[%c0_10, %c0_11] : memref<8x128xf32, #tpu.memory_space<vmem>>, vector<8x128xf32>
    tpu.vector_store %arg4[%c0_10, %c0_11], %21 {strides = array<i32>} : memref<8x128xf32, #tpu.memory_space<vmem>>, vector<8x128xf32>,
    %c0_12 = arith.constant 0 : index
    %c0_13 = arith.constant 0 : index
    %23 = vector.load %arg5[%c0_12, %c0_13] : memref<8x128xf32, #tpu.memory_space<vmem>>, vector<8x128xf32>
    %cst_14 = arith.constant dense<0xFF800000> : vector<8xf32>
    %24 = vector.multi_reduction <maximumf>, %23, %cst_14 [1] : vector<8x128xf32> to vector<8xf32>
    %25 = vector.shape_cast %24 : vector<8xf32> to vector<8x1xf32>
    %26 = vector.broadcast %25 : vector<8x1xf32> to vector<8x128xf32>
    %27 = arith.cmpf oge, %23, %26 : vector<8x128xf32>
    %28 = arith.extui %27 : vector<8x128xi1> to vector<8x128xi32>
    %29 = arith.sitofp %28 : vector<8x128xi32> to vector<8x128xf32>
    %c0_15 = arith.constant 0 : index
    %c0_16 = arith.constant 0 : index
    %30 = vector.load %arg4[%c0_15, %c0_16] : memref<8x128xf32, #tpu.memory_space<vmem>>, vector<8x128xf32>
    %31 = arith.mulf %29, %6 : vector<8x128xf32>
    %32 = arith.addf %30, %31 : vector<8x128xf32>
    %c0_17 = arith.constant 0 : index
    %c0_18 = arith.constant 0 : index
    %33 = vector.load %arg4[%c0_17, %c0_18] : memref<8x128xf32, #tpu.memory_space<vmem>>, vector<8x128xf32>
    tpu.vector_store %arg4[%c0_17, %c0_18], %32 {strides = array<i32>} : memref<8x128xf32, #tpu.memory_space<vmem>>, vector<8x128xf32>,
    %cst_19 = arith.constant 2.000000e+10 : f32
    %34 = vector.broadcast %cst_19 : f32 to vector<8x128xf32>
    %35 = arith.mulf %29, %34 : vector<8x128xf32>
    %36 = arith.subf %23, %35 : vector<8x128xf32>
    %c0_20 = arith.constant 0 : index
    %c0_21 = arith.constant 0 : index
    %37 = vector.load %arg5[%c0_20, %c0_21] : memref<8x128xf32, #tpu.memory_space<vmem>>, vector<8x128xf32>
    tpu.vector_store %arg5[%c0_20, %c0_21], %36 {strides = array<i32>} : memref<8x128xf32, #tpu.memory_space<vmem>>, vector<8x128xf32>,
    %c1_i32_22 = arith.constant 1 : i32
    %c2_i32 = arith.constant 2 : i32
    %38 = arith.select %0, %c1_i32_22, %c2_i32 : i32
    %c1_i32_23 = arith.constant 1 : i32
    %39 = arith.cmpi sgt, %38, %c1_i32_23 : i32
    %40 = arith.extui %39 : i1 to i32
    %c0_i32 = arith.constant 0 : i32
    %41 = arith.cmpi ne, %40, %c0_i32 : i32
    scf.if %41 {
      %c0_26 = arith.constant 0 : index
      %c0_27 = arith.constant 0 : index
      %47 = vector.load %arg5[%c0_26, %c0_27] : memref<8x128xf32, #tpu.memory_space<vmem>>, vector<8x128xf32>
      %cst_28 = arith.constant dense<0xFF800000> : vector<8xf32>
      %48 = vector.multi_reduction <maximumf>, %47, %cst_28 [1] : vector<8x128xf32> to vector<8xf32>
      %49 = vector.shape_cast %48 : vector<8xf32> to vector<8x1xf32>
      %50 = vector.broadcast %49 : vector<8x1xf32> to vector<8x128xf32>
      %51 = arith.cmpf oge, %47, %50 : vector<8x128xf32>
      %52 = arith.extui %51 : vector<8x128xi1> to vector<8x128xi32>
      %53 = arith.sitofp %52 : vector<8x128xi32> to vector<8x128xf32>
      %c0_29 = arith.constant 0 : index
      %c0_30 = arith.constant 0 : index
      %54 = vector.load %arg4[%c0_29, %c0_30] : memref<8x128xf32, #tpu.memory_space<vmem>>, vector<8x128xf32>
      %55 = arith.mulf %53, %6 : vector<8x128xf32>
      %56 = arith.addf %54, %55 : vector<8x128xf32>
      %c0_31 = arith.constant 0 : index
      %c0_32 = arith.constant 0 : index
      %57 = vector.load %arg4[%c0_31, %c0_32] : memref<8x128xf32, #tpu.memory_space<vmem>>, vector<8x128xf32>
      tpu.vector_store %arg4[%c0_31, %c0_32], %56 {strides = array<i32>} : memref<8x128xf32, #tpu.memory_space<vmem>>, vector<8x128xf32>,
      %cst_33 = arith.constant 2.000000e+10 : f32
      %58 = vector.broadcast %cst_33 : f32 to vector<8x128xf32>
      %59 = arith.mulf %53, %58 : vector<8x128xf32>
      %60 = arith.subf %47, %59 : vector<8x128xf32>
      %c0_34 = arith.constant 0 : index
      %c0_35 = arith.constant 0 : index
      %61 = vector.load %arg5[%c0_34, %c0_35] : memref<8x128xf32, #tpu.memory_space<vmem>>, vector<8x128xf32>
      tpu.vector_store %arg5[%c0_34, %c0_35], %60 {strides = array<i32>} : memref<8x128xf32, #tpu.memory_space<vmem>>, vector<8x128xf32>,
    } else {
    }
    %true = arith.constant true
    %42 = arith.xori %0, %true : i1
    %43 = arith.extui %42 : i1 to i32
    %c0_i32_24 = arith.constant 0 : i32
    %44 = arith.cmpi ne, %43, %c0_i32_24 : i32
    scf.if %44 {
      %c0_26 = arith.constant 0 : index
      %c0_27 = arith.constant 0 : index
      %47 = vector.load %arg1[%c0_26, %c0_27] : memref<8x128xf32, #tpu.memory_space<vmem>>, vector<8x128xf32>
      %cst_28 = arith.constant 1.000000e+00 : f32
      %48 = vector.broadcast %cst_28 : f32 to vector<8x128xf32>
      %49 = arith.subf %48, %6 : vector<8x128xf32>
      %cst_29 = arith.constant 1.000000e+10 : f32
      %50 = vector.broadcast %cst_29 : f32 to vector<8x128xf32>
      %51 = arith.mulf %49, %50 : vector<8x128xf32>
      %52 = arith.subf %47, %51 : vector<8x128xf32>
      %cst_30 = arith.constant dense<0xFF800000> : vector<8xf32>
      %53 = vector.multi_reduction <maximumf>, %52, %cst_30 [1] : vector<8x128xf32> to vector<8xf32>
      %54 = vector.shape_cast %53 : vector<8xf32> to vector<8x1xf32>
      %55 = vector.broadcast %54 : vector<8x1xf32> to vector<8x128xf32>
      %56 = arith.subf %52, %55 : vector<8x128xf32>
      %57 = math.exp %56 : vector<8x128xf32>
      %58 = arith.mulf %57, %6 : vector<8x128xf32>
      %cst_31 = arith.constant dense<0.000000e+00> : vector<8xf32>
      %59 = vector.multi_reduction <add>, %58, %cst_31 [1] : vector<8x128xf32> to vector<8xf32>
      %60 = vector.shape_cast %59 : vector<8xf32> to vector<8x1xf32>
      %cst_32 = arith.constant 1.000000e-30 : f32
      %61 = vector.broadcast %cst_32 : f32 to vector<8x1xf32>
      %62 = arith.addf %60, %61 : vector<8x1xf32>
      %63 = tpu.reciprocal %62 {approx = true} : vector<8x1xf32> -> vector<8x1xf32>
      %64 = vector.broadcast %63 : vector<8x1xf32> to vector<8x128xf32>
      %65 = arith.mulf %58, %64 : vector<8x128xf32>
      %c0_33 = arith.constant 0 : index
      %c0_34 = arith.constant 0 : index
      %66 = vector.load %arg4[%c0_33, %c0_34] : memref<8x128xf32, #tpu.memory_space<vmem>>, vector<8x128xf32>
      %67 = arith.mulf %65, %66 : vector<8x128xf32>
      %c0_35 = arith.constant 0 : index
      %c0_36 = arith.constant 0 : index
      %68 = vector.load %arg3[%c0_35, %c0_36] : memref<8x128xf32, #tpu.memory_space<vmem>>, vector<8x128xf32>
      tpu.vector_store %arg3[%c0_35, %c0_36], %67 {strides = array<i32>} : memref<8x128xf32, #tpu.memory_space<vmem>>, vector<8x128xf32>,
    } else {
    }
    %45 = arith.extui %0 : i1 to i32
    %c0_i32_25 = arith.constant 0 : i32
    %46 = arith.cmpi ne, %45, %c0_i32_25 : i32
    scf.if %46 {
      %c0_26 = arith.constant 0 : index
      %c0_27 = arith.constant 0 : index
      %47 = vector.load %arg4[%c0_26, %c0_27] : memref<8x128xf32, #tpu.memory_space<vmem>>, vector<8x128xf32>
      %cst_28 = arith.constant 1.000000e+00 : f32
      %48 = vector.broadcast %cst_28 : f32 to vector<8x128xf32>
      %49 = arith.subf %48, %47 : vector<8x128xf32>
      %50 = arith.mulf %49, %6 : vector<8x128xf32>
      %c0_29 = arith.constant 0 : index
      %c0_30 = arith.constant 0 : index
      %51 = vector.load %arg3[%c0_29, %c0_30] : memref<8x128xf32, #tpu.memory_space<vmem>>, vector<8x128xf32>
      tpu.vector_store %arg3[%c0_29, %c0_30], %50 {strides = array<i32>} : memref<8x128xf32, #tpu.memory_space<vmem>>, vector<8x128xf32>,
    } else {
    }
    return
  }
  func.func @transform_0(%arg0: i32) -> (i32, i32) {
    %c0_i32 = arith.constant 0 : i32
    %c0_i32_0 = arith.constant 0 : i32
    return %arg0, %c0_i32 : i32, i32
  }
  func.func @transform_1(%arg0: i32) -> (i32, i32) {
    %c0_i32 = arith.constant 0 : i32
    %c0_i32_0 = arith.constant 0 : i32
    return %arg0, %c0_i32 : i32, i32
  }
  func.func @transform_2(%arg0: i32) -> (i32, i32) {
    %c0_i32 = arith.constant 0 : i32
    %c0_i32_0 = arith.constant 0 : i32
    return %arg0, %c0_i32 : i32, i32
  }
}

</mosaic_0001>

<bundles_post_ra>
// kernel: _forward_weights.1
= control target key start
LH: loop header
LB: loop body
LE: loop exit
PB: predicated region body
PF: predicated region fallthrough
CT: control target
= control target key end

     0   :  { %s359_s9 = smov 0   ;;  %s402_s0 = inlined_call_operand.vmem [shape: f32[16,128], index: 0, kind: input, shape index: {}]   ;;  %s403_s1 = inlined_call_operand.vmem [shape: s32[16,1], index: 1, kind: input, shape index: {}]   ;;  %s404_s2 = inlined_call_operand.vmem [shape: f32[16,128], index: 2, kind: output, shape index: {}]  }
   0x1 LB: > { %s365_s10 = sadd.s32 4294967295, %s339_s9   ;;  %p305_p0 = scmp.ge.s32.totalorder %s339_s9, 1  ;;  %s339_s9 = sphi %s359_s9, %s12_s9  }
   0x2   : > { %p120_p1 = scmp.lt.s32.totalorder %s339_s9, 3 }
   0x4   : > { %p121_p2 = pnand %p305_p0, %p120_p1 }
   0x5   : > { %p144_p3 = scmp.lt.s32.totalorder (!%p121_p2), %s365_s10, 1  ;;  %p156_p4 = scmp.ge.s32.totalorder (!%p121_p2), %s365_s10, 1 }
   0x6   : > { %124 = sbr.rel (%p121_p2) target bundleno = 783 (0x30f), region = 28 }
   0xb   : > { %v341_v0 = vmov 0   ;;  %s145_s11 = scalar_select %p144_p3, %s365_s10, 1  ;;  %v157_v2 = vlaneseq  ;;  %v342_v8 = vmov 0.0  }
   0xc   : > { %328 = vset.pattern.permute.xlu0 %v341_v0  ;;  %s166_s19 = scalar_select %p156_p4, -1.0, 1.0 }
   0xd   : > { %s306_s12 = sshll.u32 %s145_s11, 3  ;;  %v158_v3 = vand.u32 127, %v157_v2 }
   0xe   : > { %s151_s15 = scalar_lea.vmem %s403_s1, %s306_s12  ;;  %s379_s18 = scalar_lea.vmem %s404_s2, %s306_s12  ;;  %v168_v4 = vstv %s166_s19 }
   0xf   : > { %v159_v1 = vld [vmem:[%s151_s15] sm:$0xff]  ;;  %s387_s22 = scalar_lea.vmem %s402_s0, %s306_s12  ;;  %v173_v7 = vcvt.s32.f32 %v158_v3 }
  0x10   : > { %161 = vperm.xlu0 %328, %v159_v1   ;;  %v167_v5 = vld [vmem:[%s387_s22] sm:$0xff] }
  0x11   : > { %v169_v10 = vmul.f32 %v168_v4, %v167_v5  ;;  %v174_v12 = vmul.f32 1e-06, %v173_v7 }
  0x8b   : > { %v162_v6 = vpop.permute.xlu0 %161 }
  0x8c   : > { %vm163_vm0 = vcmp.lt.s32.totalorder %v158_v3, %v162_v6 }
  0x8d   : > { %v309_v9 = vsel %vm163_vm0, 1.0, %v342_v8 }
  0x8e   : > { %v170_v11 = vsub.f32 1.0, %v309_v9 }
  0x90   : > { %v171_v13 = vmul.f32 1e+10, %v170_v11 }
  0x92   : > { %v172_v14 = vsub.f32 %v169_v10, %v171_v13 }
  0x94   : > { %v175_v15 = vsub.f32 %v172_v14, %v174_v12 }
  0x96   : > { %179 = vmax.xlane.f32.xlu0 %v175_v15 }
 0x11f   : > { %v180_v16 = vpop.xlane.xlu0 %179 }
 0x120   : > { %vm181_vm1 = vcmp.ge.f32.partialorder %v175_v15, %v180_v16 }
 0x121   : > { %v310_v17 = vsel %vm181_vm1, 1.0, %v342_v8 }
 0x122   : > { %v185_v18 = vmul.f32 %v310_v17, %v309_v9  ;;  %v188_v19 = vmul.f32 2e+10, %v310_v17  ;;  %195 = sbr.rel (%p156_p4) target bundleno = 447 (0x1bf), region = 32 }
 0x124   : > { %v189_v20 = vsub.f32 %v175_v15, %v188_v19  ;;  %187 = vst [vmem:[#allocation2] sm:$0xff] %v185_v18 }
 0x126   : > { %190 = vst [vmem:[#allocation3] sm:$0xff] %v189_v20 }
 0x127   : > { %v343_v23 = vmov 0.0  }
 0x12b   : > { %v202_v25 = vld [vmem:[#allocation2] sm:$0xff] }
 0x12d   : > { %v196_v21 = vld [vmem:[#allocation3] sm:$0xff] }
 0x12e   : > { %197 = vmax.xlane.f32.xlu0 %v196_v21 }
 0x1b7   : > { %v198_v22 = vpop.xlane.xlu0 %197 }
 0x1b8   : > { %vm199_vm2 = vcmp.ge.f32.partialorder %v196_v21, %v198_v22 }
 0x1b9   : > { %v312_v24 = vsel %vm199_vm2, 1.0, %v343_v23 }
 0x1ba   : > { %v203_v26 = vmul.f32 %v312_v24, %v309_v9  ;;  %v206_v27 = vmul.f32 2e+10, %v312_v24 }
 0x1bc   : > { %v204_v28 = vadd.f32 %v203_v26, %v202_v25  ;;  %v207_v29 = vsub.f32 %v196_v21, %v206_v27 }
 0x1be   : > { %205 = vst [vmem:[#allocation2] sm:$0xff] %v204_v28  ;;  %208 = vst [vmem:[#allocation3] sm:$0xff] %v207_v29 }
 0x1bf PF: > { %212 = sbr.rel (%p156_p4) target bundleno = 772 (0x304), region = 36 }
 0x1c4   : > { %v213_v30 = vld [vmem:[%s387_s22] sm:$0xff] }
 0x1c5   : > { %v214_v31 = vsub.f32 %v213_v30, %v171_v13  ;;  %v226_v40 = vld [vmem:[#allocation2] sm:$0xff] }
 0x1c7   : > { %215 = vmax.xlane.f32.xlu0 %v214_v31 }
 0x250   : > { %v216_v32 = vpop.xlane.xlu0 %215 }
 0x251   : > { %v217_v33 = vsub.f32 %v214_v31, %v216_v32 }
 0x253   : > { %v218_v34 = vmul.f32 1.442695, %v217_v33 }
 0x255   : > { %329 = vpow2.f32 %v218_v34 }
 0x262   : > { %v330_v35 = vpop.eup %329 }
 0x263   : > { %v220_v36 = vmul.f32 %v330_v35, %v309_v9 }
 0x265   : > { %221 = vadd.xlane.f32.xlu0 %v220_v36 }
 0x2ee   : > { %v222_v37 = vpop.xlane.xlu0 %221 }
 0x2ef   : > { %v223_v38 = vadd.f32 1e-30, %v222_v37 }
 0x2f1   : > { %331 = vrcp.f32 %v223_v38 }
 0x2fe   : > { %v332_v39 = vpop.eup %331 }
 0x2ff   : > { %v225_v41 = vmul.f32 %v332_v39, %v220_v36 }
 0x301   : > { %v227_v42 = vmul.f32 %v226_v40, %v225_v41 }
 0x303   : > { %228 = vst [vmem:[%s379_s18] sm:$0xff] %v227_v42 }
 0x304 PF: > { %231 = sbr.rel (%p144_p3) target bundleno = 783 (0x30f), region = 40 }
 0x309   : > { %v232_v43 = vld [vmem:[#allocation2] sm:$0xff] }
 0x30a   : > { %v233_v44 = vsub.f32 1.0, %v232_v43 }
 0x30c   : > { %v234_v45 = vmul.f32 %v309_v9, %v233_v44 }
 0x30e   : > { %235 = vst [vmem:[%s379_s18] sm:$0xff] %v234_v45 }
 0x30f PF: > { %s12_s9 = sadd.s32 1, %s339_s9  }
 0x310   : > { %p9_p5 = scmp.ge.s32.totalorder %s12_s9, 4  }
 0x312   :  { %11 = sbr.rel (!%p9_p5) target bundleno = 1 (0x1), region = 73 }

</bundles_post_ra>
